<compile_context>
chip_gen: v7x
topology: tpu7x:2x2x1
jax: 0.10.0
libtpu: 0.0.40
codegen_flags: <defaults>
</compile_context>

<pallas_src>
import functools
import math

import jax
import jax.numpy as jnp
from jax.experimental import pallas as pl
from jax.experimental.pallas import tpu as pltpu


def _round_up(v, m):
    return ((v + m - 1) // m) * m


def _cdiv(a, b):
    return -(-a // b)


def _pick_vmem_limit():
    # v5e/v6e: 128 MiB physical -> 96 MiB scoped; v7x: 64 MiB -> 48 MiB.
    cap = 128 * 1024 * 1024
    try:
        cap = int(getattr(pltpu.get_tpu_info(), "vmem_capacity_bytes", cap))
    except Exception:
        pass
    return max(32 * 1024 * 1024, min(cap * 3 // 4, 100 * 1024 * 1024))


# ---------------------------------------------------------------------------
# Loss kernel: sum over tokens of ||normalize(x) - normalize(cache[gold])||^2.
# Pad rows were replaced by x rows in the wrapper, so they contribute 0 and no
# mask input is needed.  Grid: (core 'parallel', token tiles 'arbitrary').
# Each core writes a lane-wise partial sum; the wrapper does the final reduce.
# ---------------------------------------------------------------------------
def _loss_kernel(x_ref, c_ref, part_ref, acc_ref):
    n = pl.program_id(1)

    @pl.when(n == 0)
    def _init():
        acc_ref[...] = jnp.zeros_like(acc_ref)

    x = x_ref[...].astype(jnp.float32)     # native dtype in HBM (bf16 halves DMA)
    c = c_ref[...].astype(jnp.float32)
    eps = 1e-12
    x_n = x * jax.lax.rsqrt(jnp.sum(x * x, axis=-1, keepdims=True) + eps)
    c_n = c * jax.lax.rsqrt(jnp.sum(c * c, axis=-1, keepdims=True) + eps)
    d = x_n - c_n
    acc_ref[...] += jnp.sum(d * d, axis=0, keepdims=True)       # (1, D) partial

    @pl.when(n == pl.num_programs(1) - 1)
    def _fin():
        row = jax.lax.broadcasted_iota(jnp.int32, part_ref.shape, 0)
        part_ref[...] = jnp.where(row == 0, acc_ref[...], 0.0)  # (8, D) block


def _loss_tiles(N, D, block_tokens):
    if block_tokens is None:
        # D-aware: >= ~2 MiB per input block (f32 worst case), at least 512 tok.
        block_tokens = max(512, (2 << 20) // (4 * max(D, 1)))
    n_t = _round_up(min(block_tokens, max(N, 8)), 8)
    tiles = _cdiv(N, n_t)
    cores = 2 if tiles >= 2 else 1          # feed both v7x TCs; no-op on 1-TC chips
    tpc = _cdiv(tiles, cores)
    n_pad = cores * tpc * n_t
    return n_t, cores, tpc, n_pad


def _loss_pallas(x, c, n_t, cores, tpc, vmem_limit):
    _, d = x.shape
    partials = pl.pallas_call(
        _loss_kernel,
        out_shape=jax.ShapeDtypeStruct((cores * 8, d), jnp.float32),
        grid_spec=pltpu.PrefetchScalarGridSpec(
            num_scalar_prefetch=0,
            grid=(cores, tpc),
            in_specs=[
                pl.BlockSpec((n_t, d), lambda ci, n: (ci * tpc + n, 0)),  # x
                pl.BlockSpec((n_t, d), lambda ci, n: (ci * tpc + n, 0)),  # cache[gold]
            ],
            out_specs=pl.BlockSpec((8, d), lambda ci, n: (ci, 0)),
            scratch_shapes=[pltpu.VMEM((1, d), jnp.float32)],
        ),
        compiler_params=pltpu.CompilerParams(
            dimension_semantics=("parallel", "arbitrary"),
            vmem_limit_bytes=vmem_limit,
        ),
    )(x, c)
    return jnp.sum(partials)


# ---------------------------------------------------------------------------
# Update kernel: per-vocab scatter-add of (x * p_gold, pads zeroed).  Tokens are
# pre-sorted by gold id; scalar-prefetched [tile_lo, tile_hi) per vocab tile
# limits both the DMA (clamped index_map) and the one-hot MXU matmul (pl.when)
# to the token tiles that actually contain this vocab tile's ids.
# Grid: (vocab tiles 'parallel', token tiles 'arbitrary').
# ---------------------------------------------------------------------------
def _update_kernel(lo_ref, hi_ref, gold_ref, w_ref, cache_ref, newc_ref,
                   acc_ref, cnt_ref, *, beta):
    i = pl.program_id(0)          # vocab tile
    n = pl.program_id(1)          # token tile (reduction axis)
    v_t = cache_ref.shape[0]
    n_t = gold_ref.shape[1]

    @pl.when(n == 0)
    def _init():
        acc_ref[...] = jnp.zeros_like(acc_ref)
        cnt_ref[...] = jnp.zeros_like(cnt_ref)

    @pl.when(jnp.logical_and(n >= lo_ref[i], n < hi_ref[i]))
    def _work():
        gold = gold_ref[...]                                            # (1, n_t) int32
        vocab_ids = jax.lax.broadcasted_iota(jnp.int32, (v_t, n_t), 0) + i * v_t
        hit = vocab_ids == gold                                         # (v_t, n_t)
        # counts: unmasked, matching torch's unique(return_counts=True) on raw
        # gold; f32 accumulation is exact up to 2**24 tokens per vocab id.
        cnt_ref[...] += jnp.sum(hit.astype(jnp.float32), axis=1, keepdims=True)
        # scatter-add on the MXU: bf16 one-hot (exact) @ bf16 w, f32 accumulate.
        acc_ref[...] += jax.lax.dot_general(
            hit.astype(jnp.bfloat16), w_ref[...],
            (((1,), (0,)), ((), ())),
            preferred_element_type=jnp.float32)

    @pl.when(n == pl.num_programs(1) - 1)
    def _fin():
        cnt = cnt_ref[...]
        present = cnt > 0.0
        inv = pl.reciprocal(jnp.where(present, cnt, 1.0))       # per-row reciprocal
        base = acc_ref[...] * inv
        cache = cache_ref[...]
        updated = beta * cache + (1.0 - beta) * base
        newc_ref[...] = jnp.where(present, updated, cache)


def _update_tiles(N, V, n_tile, v_tile, align=256):
    # 256-aligned M/K feeds the 2x256x256 MXU on v6e/v7x (v5e is fine too).
    if V <= v_tile:
        v_t = _round_up(max(V, 1), align)
        v_pad = v_t
    else:
        v_t = _round_up(v_tile, align)
        v_pad = _round_up(V, v_t)
    if N <= n_tile:
        n_t = _round_up(max(N, 1), align)
        n_pad = n_t
    else:
        n_t = _round_up(n_tile, align)
        n_pad = _round_up(N, n_t)
    return n_t, n_pad, v_t, v_pad


def _update_pallas(tile_lo, tile_hi, gold_row, w, cache, beta, v_t, n_t,
                   vmem_limit):
    v_pad, d = cache.shape
    n_pad = gold_row.shape[1]
    num_n_tiles = n_pad // n_t

    def _blk(n, lo, hi):
        # Token-tile index actually fetched: clamped to this vocab tile's live
        # range so skipped grid steps repeat the previous block index (no DMA).
        return jnp.clip(n, lo, jnp.maximum(hi - 1, lo))

    gold_map = lambda i, n, lo, hi: (0, _blk(n, lo[i], hi[i]))
    w_map = lambda i, n, lo, hi: (_blk(n, lo[i], hi[i]), 0)

    kernel = functools.partial(_update_kernel, beta=float(beta))

    def _call(io_aliases):
        return pl.pallas_call(
            kernel,
            out_shape=jax.ShapeDtypeStruct((v_pad, d), jnp.float32),
            grid_spec=pltpu.PrefetchScalarGridSpec(
                num_scalar_prefetch=2,                       # tile_lo, tile_hi
                grid=(v_pad // v_t, num_n_tiles),
                in_specs=[
                    pl.BlockSpec((1, n_t), gold_map),        # sorted gold (lanes)
                    pl.BlockSpec((n_t, d), w_map),           # sorted x*p_gold*keep (bf16)
                    pl.BlockSpec((v_t, d), lambda i, n, lo, hi: (i, 0)),  # cache
                ],
                out_specs=pl.BlockSpec((v_t, d), lambda i, n, lo, hi: (i, 0)),
                scratch_shapes=[
                    pltpu.VMEM((v_t, d), jnp.float32),       # per-vocab weighted sums
                    pltpu.VMEM((v_t, 1), jnp.float32),       # per-vocab token counts
                ],
            ),
            input_output_aliases=io_aliases,
            compiler_params=pltpu.CompilerParams(
                dimension_semantics=("parallel", "arbitrary"),
                vmem_limit_bytes=vmem_limit,
            ),
        )(tile_lo, tile_hi, gold_row, w, cache)

    try:
        # Operand indices count the scalar-prefetch args (megablox convention):
        # 0: tile_lo, 1: tile_hi, 2: gold, 3: w, 4: cache -> aliased to output 0.
        return _call({4: 0})
    except Exception:
        # Alias-index convention mismatch on this JAX version: fall back to a
        # non-aliased (copying) update rather than failing.
        return _call({})


# ---------------------------------------------------------------------------
# Functional wrapper (equivalent of Cache.forward).  Returns (loss, new_cache_p).
# Host-side step bookkeeping (cache_update_steps, warm-up) stays in Python.
# ---------------------------------------------------------------------------
def cache_forward(x, p, gold, cache_p, *, pad_id=0, mavg_beta=0.0,
                  warm_cache_steps=0, warm_mvavg_steps=0,
                  cache_update_steps=0, update_cache=True,
                  n_tile=1024, v_tile=512, loss_block_tokens=None):
    B, S, D = x.shape
    V = p.shape[-1]
    N = B * S
    vmem_limit = _pick_vmem_limit()

    x2 = x.reshape(N, D)                          # native dtype: no forced f32 upcast
    g = gold.reshape(N).astype(jnp.int32)
    keep = g != pad_id                            # True at non-pad tokens
    cache32 = cache_p.astype(jnp.float32)

    compute_loss = cache_update_steps >= warm_cache_steps

    # ---------------- loss path (get_loss) ----------------
    if compute_loss:
        # Row gather of cache_p at gold as an XLA gather (pure DMA cost), in x's
        # dtype so the (HBM-bound) loss kernel streams bf16 when x is bf16.
        c_l = jnp.take(cache32, g, axis=0).astype(x.dtype)              # (N, D)
        # Pad rows contribute exactly 0 -> no mask input / broadcast in-kernel.
        c_l = jnp.where(keep[:, None], c_l, x2)
        n_t_l, cores, tpc, n_pad_l = _loss_tiles(N, D, loss_block_tokens)
        dn = n_pad_l - N
        x_l = jnp.pad(x2, ((0, dn), (0, 0))) if dn else x2
        c_l = jnp.pad(c_l, ((0, dn), (0, 0))) if dn else c_l
        loss = _loss_pallas(x_l, c_l, n_t_l, cores, tpc, vmem_limit)
        loss_out = loss.reshape(1).astype(x.dtype)
    else:
        loss_out = jnp.zeros((1,), x.dtype)                             # x.new_zeros(1)

    # ---------------- update path (update_cache) ----------------
    if update_cache:
        n_t, n_pad, v_t, v_pad = _update_tiles(N, V, n_tile, v_tile)
        # p gathered at gold in the wrapper -> (N,1); the (N,V) tensor never
        # enters a kernel.
        p_gold = jnp.take_along_axis(
            p.reshape(N, V), g[:, None], axis=-1).astype(jnp.float32)
        w = (x2.astype(jnp.float32) * p_gold
             * keep.astype(jnp.float32)[:, None]).astype(jnp.bfloat16)  # masked at pads

        dn = n_pad - N
        # Padded tokens get gold = v_pad: they sort to the end and never match
        # any vocab row (pad_id rows are still counted, matching torch).
        g_u = jnp.pad(g, (0, dn), constant_values=v_pad) if dn else g
        w_u = jnp.pad(w, ((0, dn), (0, 0))) if dn else w

        # Sort tokens by gold so each vocab tile only visits the contiguous
        # token tiles containing its ids (MXU flops ~O(N*D), w streamed ~once).
        order = jnp.argsort(g_u)
        g_sorted = jnp.take(g_u, order)
        w_sorted = jnp.take(w_u, order, axis=0)

        num_v_tiles = v_pad // v_t
        num_n_tiles = n_pad // n_t
        bounds = jnp.arange(num_v_tiles + 1, dtype=jnp.int32) * v_t
        pos = jnp.searchsorted(g_sorted, bounds, side="left").astype(jnp.int32)
        tile_lo = jnp.minimum(pos[:-1] // n_t, num_n_tiles - 1).astype(jnp.int32)
        tile_hi = jnp.minimum((pos[1:] + n_t - 1) // n_t, num_n_tiles).astype(jnp.int32)

        dv = v_pad - V
        cache_in = jnp.pad(cache32, ((0, dv), (0, 0))) if dv else cache32

        # warm-up ramp of the moving-average beta (host-side, like torch)
        if cache_update_steps >= warm_mvavg_steps:
            beta_eff = float(mavg_beta)
        else:
            beta_eff = float(mavg_beta) * math.sqrt(
                float(cache_update_steps) / float(warm_mvavg_steps))

        new_cache = _update_pallas(tile_lo, tile_hi, g_sorted.reshape(1, n_pad),
                                   w_sorted, cache_in, beta_eff, v_t, n_t,
                                   vmem_limit)
        if dv:
            new_cache = new_cache[:V]
    else:
        new_cache = cache32

    return loss_out, new_cache


# ---------------------------------------------------------------------------
# Pure-JAX reference (same assumed norm_func / loss_func, same bf16 rounding of
# the scattered values) used to sanity-check the Pallas path.
# ---------------------------------------------------------------------------
def _reference_forward(x, p, gold, cache_p, *, pad_id, mavg_beta,
                       warm_cache_steps, warm_mvavg_steps, cache_update_steps,
                       update_cache=True):
    B, S, D = x.shape
    V = p.shape[-1]
    N = B * S
    x2 = x.reshape(N, D).astype(jnp.float32)
    g = gold.reshape(N).astype(jnp.int32)
    keep = (g != pad_id).astype(jnp.float32)[:, None]
    cache = cache_p.astype(jnp.float32)
    eps = 1e-12

    if cache_update_steps >= warm_cache_steps:
        c_p = cache[g]
        xn = x2 * jax.lax.rsqrt(jnp.sum(x2 * x2, -1, keepdims=True) + eps)
        cn = c_p * jax.lax.rsqrt(jnp.sum(c_p * c_p, -1, keepdims=True) + eps)
        loss = jnp.sum((xn - cn) ** 2 * keep).reshape(1).astype(x.dtype)
    else:
        loss = jnp.zeros((1,), x.dtype)

    if update_cache:
        p_gold = jnp.take_along_axis(
            p.reshape(N, V), g[:, None], axis=-1).astype(jnp.float32)
        w = (x2 * p_gold * keep).astype(jnp.bfloat16).astype(jnp.float32)
        sums = jax.ops.segment_sum(w, g, num_segments=V)
        cnt = jax.ops.segment_sum(jnp.ones((N,), jnp.float32), g,
                                  num_segments=V)[:, None]
        present = cnt > 0.0
        base = sums / jnp.where(present, cnt, 1.0)
        if cache_update_steps >= warm_mvavg_steps:
            beta = float(mavg_beta)
        else:
            beta = float(mavg_beta) * math.sqrt(
                float(cache_update_steps) / float(warm_mvavg_steps))
        new_cache = jnp.where(present, beta * cache + (1.0 - beta) * base, cache)
    else:
        new_cache = cache
    return loss, new_cache


if __name__ == "__main__":
    key = jax.random.PRNGKey(0)
    # Small, deliberately non-aligned shapes so the sorted/grouped update path
    # sees 3 vocab tiles x 2 token tiles (with skipped pairs and token padding)
    # and the loss path uses 2 'cores' x 2 token tiles of 128 tokens.
    B, S, D, V = 2, 192, 64, 600
    pad_id = 0

    k1, k2, k3, k4 = jax.random.split(key, 4)
    x = jax.random.normal(k1, (B, S, D), dtype=jnp.float32)
    p = jax.nn.softmax(jax.random.normal(k2, (B, S, V), dtype=jnp.float32), axis=-1)
    gold = jax.random.randint(k3, (B, S), 0, V, dtype=jnp.int32)
    gold = gold.at[0, -7:].set(pad_id)          # a few pad positions
    cache_p = 0.1 * jax.random.normal(k4, (V, D), dtype=jnp.float32)

    kwargs = dict(pad_id=pad_id, mavg_beta=0.9, warm_cache_steps=0,
                  warm_mvavg_steps=4, cache_update_steps=2, update_cache=True)

    loss, new_cache = cache_forward(x, p, gold, cache_p,
                                    n_tile=256, v_tile=256,
                                    loss_block_tokens=128, **kwargs)
    jax.block_until_ready((loss, new_cache))

    ref_loss, ref_cache = _reference_forward(x, p, gold, cache_p, **kwargs)
    ok = (bool(jnp.allclose(loss, ref_loss, rtol=2e-3, atol=2e-3)) and
          bool(jnp.allclose(new_cache, ref_cache, rtol=2e-3, atol=2e-3)))
    if ok:
        print("KERNEL_OK")
    else:
        print("MISMATCH loss:", float(loss[0]), "ref:", float(ref_loss[0]),
              "max|d cache|:", float(jnp.max(jnp.abs(new_cache - ref_cache))))
</pallas_src>

<mosaic_0001>
module attributes {stable_mosaic.version = 11 : i64} {
  func.func @_loss_kernel(%arg0: i32, %arg1: i32, %arg2: memref<128x64xf32, #tpu.memory_space<vmem>>, %arg3: memref<128x64xf32, #tpu.memory_space<vmem>>, %arg4: memref<8x64xf32, #tpu.memory_space<vmem>>, %arg5: memref<1x64xf32, #tpu.memory_space<vmem>>) attributes {dimension_semantics = [#tpu.dimension_semantics<parallel>, #tpu.dimension_semantics<arbitrary>], iteration_bounds = array<i64: 2, 2>, scalar_prefetch = 0 : i64, scratch_operands = 1 : i64, tpu.core_type = #tpu.core_type<tc>, window_params = [{transform_indices = @transform_0, window_bounds = array<i64: 128, 64>}, {transform_indices = @transform_1, window_bounds = array<i64: 128, 64>}, {transform_indices = @transform_2, window_bounds = array<i64: 8, 64>}]} {
    %c0_i32 = arith.constant 0 : i32
    %0 = arith.cmpi eq, %arg1, %c0_i32 : i32
    %1 = arith.extui %0 : i1 to i32
    %c0_i32_0 = arith.constant 0 : i32
    %2 = arith.cmpi ne, %1, %c0_i32_0 : i32
    scf.if %2 {
      %cst_13 = arith.constant 0.000000e+00 : f32
      %31 = vector.broadcast %cst_13 : f32 to vector<1x64xf32>
      %c0_14 = arith.constant 0 : index
      %c0_15 = arith.constant 0 : index
      %32 = vector.load %arg5[%c0_14, %c0_15] : memref<1x64xf32, #tpu.memory_space<vmem>>, vector<1x64xf32>
      tpu.vector_store %arg5[%c0_14, %c0_15], %31 {strides = array<i32>} : memref<1x64xf32, #tpu.memory_space<vmem>>, vector<1x64xf32>,
    } else {
    }
    %c0 = arith.constant 0 : index
    %c0_1 = arith.constant 0 : index
    %3 = vector.load %arg2[%c0, %c0_1] : memref<128x64xf32, #tpu.memory_space<vmem>>, vector<128x64xf32>
    %c0_2 = arith.constant 0 : index
    %c0_3 = arith.constant 0 : index
    %4 = vector.load %arg3[%c0_2, %c0_3] : memref<128x64xf32, #tpu.memory_space<vmem>>, vector<128x64xf32>
    %5 = arith.mulf %3, %3 : vector<128x64xf32>
    %cst = arith.constant dense<0.000000e+00> : vector<128xf32>
    %6 = vector.multi_reduction <add>, %5, %cst [1] : vector<128x64xf32> to vector<128xf32>
    %7 = vector.shape_cast %6 : vector<128xf32> to vector<128x1xf32>
    %cst_4 = arith.constant 9.99999996E-13 : f32
    %8 = vector.broadcast %cst_4 : f32 to vector<128x1xf32>
    %9 = arith.addf %7, %8 : vector<128x1xf32>
    %10 = math.rsqrt %9 : vector<128x1xf32>
    %11 = vector.broadcast %10 : vector<128x1xf32> to vector<128x64xf32>
    %12 = arith.mulf %3, %11 : vector<128x64xf32>
    %13 = arith.mulf %4, %4 : vector<128x64xf32>
    %cst_5 = arith.constant dense<0.000000e+00> : vector<128xf32>
    %14 = vector.multi_reduction <add>, %13, %cst_5 [1] : vector<128x64xf32> to vector<128xf32>
    %15 = vector.shape_cast %14 : vector<128xf32> to vector<128x1xf32>
    %cst_6 = arith.constant 9.99999996E-13 : f32
    %16 = vector.broadcast %cst_6 : f32 to vector<128x1xf32>
    %17 = arith.addf %15, %16 : vector<128x1xf32>
    %18 = math.rsqrt %17 : vector<128x1xf32>
    %19 = vector.broadcast %18 : vector<128x1xf32> to vector<128x64xf32>
    %20 = arith.mulf %4, %19 : vector<128x64xf32>
    %21 = arith.subf %12, %20 : vector<128x64xf32>
    %c0_7 = arith.constant 0 : index
    %c0_8 = arith.constant 0 : index
    %22 = vector.load %arg5[%c0_7, %c0_8] : memref<1x64xf32, #tpu.memory_space<vmem>>, vector<1x64xf32>
    %23 = arith.mulf %21, %21 : vector<128x64xf32>
    %cst_9 = arith.constant dense<0.000000e+00> : vector<64xf32>
    %24 = vector.multi_reduction <add>, %23, %cst_9 [0] : vector<128x64xf32> to vector<64xf32>
    %25 = vector.shape_cast %24 : vector<64xf32> to vector<1x64xf32>
    %26 = arith.addf %22, %25 : vector<1x64xf32>
    %c0_10 = arith.constant 0 : index
    %c0_11 = arith.constant 0 : index
    %27 = vector.load %arg5[%c0_10, %c0_11] : memref<1x64xf32, #tpu.memory_space<vmem>>, vector<1x64xf32>
    tpu.vector_store %arg5[%c0_10, %c0_11], %26 {strides = array<i32>} : memref<1x64xf32, #tpu.memory_space<vmem>>, vector<1x64xf32>,
    %c1_i32 = arith.constant 1 : i32
    %28 = arith.cmpi eq, %arg1, %c1_i32 : i32
    %29 = arith.extui %28 : i1 to i32
    %c0_i32_12 = arith.constant 0 : i32
    %30 = arith.cmpi ne, %29, %c0_i32_12 : i32
    scf.if %30 {
      %31 = tpu.iota {dimensions = array<i32: 0>} : vector<8x64xi32>
      %c0_i32_13 = arith.constant 0 : i32
      %32 = vector.broadcast %c0_i32_13 : i32 to vector<8x64xi32>
      %33 = arith.cmpi eq, %31, %32 : vector<8x64xi32>
      %c0_14 = arith.constant 0 : index
      %c0_15 = arith.constant 0 : index
      %34 = vector.load %arg5[%c0_14, %c0_15] : memref<1x64xf32, #tpu.memory_space<vmem>>, vector<1x64xf32>
      %cst_16 = arith.constant 0.000000e+00 : f32
      %35 = vector.shape_cast %34 : vector<1x64xf32> to vector<1x64xf32>
      %36 = vector.broadcast %35 : vector<1x64xf32> to vector<8x64xf32>
      %37 = vector.broadcast %cst_16 : f32 to vector<8x64xf32>
      %38 = arith.select %33, %36, %37 : vector<8x64xi1>, vector<8x64xf32>
      %c0_17 = arith.constant 0 : index
      %c0_18 = arith.constant 0 : index
      %39 = vector.load %arg4[%c0_17, %c0_18] : memref<8x64xf32, #tpu.memory_space<vmem>>, vector<8x64xf32>
      tpu.vector_store %arg4[%c0_17, %c0_18], %38 {strides = array<i32>} : memref<8x64xf32, #tpu.memory_space<vmem>>, vector<8x64xf32>,
    } else {
    }
    return
  }
  func.func @transform_0(%arg0: i32, %arg1: i32) -> (i32, i32) {
    %c2_i32 = arith.constant 2 : i32
    %0 = arith.muli %arg0, %c2_i32 : i32
    %1 = arith.addi %0, %arg1 : i32
    %c0_i32 = arith.constant 0 : i32
    %c0_i32_0 = arith.constant 0 : i32
    return %1, %c0_i32 : i32, i32
  }
  func.func @transform_1(%arg0: i32, %arg1: i32) -> (i32, i32) {
    %c2_i32 = arith.constant 2 : i32
    %0 = arith.muli %arg0, %c2_i32 : i32
    %1 = arith.addi %0, %arg1 : i32
    %c0_i32 = arith.constant 0 : i32
    %c0_i32_0 = arith.constant 0 : i32
    return %1, %c0_i32 : i32, i32
  }
  func.func @transform_2(%arg0: i32, %arg1: i32) -> (i32, i32) {
    %c0_i32 = arith.constant 0 : i32
    %c0_i32_0 = arith.constant 0 : i32
    return %arg0, %c0_i32 : i32, i32
  }
}

</mosaic_0001>

<bundles_post_ra>
// kernel: tpu_custom_call.1
= control target key start
LH: loop header
LB: loop body
LE: loop exit
PB: predicated region body
PF: predicated region fallthrough
CT: control target
= control target key end

     0   :  { %s1653_s0 = inlined_call_operand.hbm [shape: f32[512,64], index: 0, kind: input, shape index: {}]   ;;  %s1654_s1 = inlined_call_operand.hbm [shape: f32[512,64], index: 1, kind: input, shape index: {}]   ;;  %s1655_s2 = inlined_call_operand.hbm [shape: f32[16,64], index: 2, kind: output, shape index: {}]  }
   0x1   :  { %1664 = sst [smem:[#allocation16_spill]] %s1653_s0 }
   0x2   :  { %7 = vsyncpa [#allocation4], 0 }
   0x3   :  { %9 = vsyncpa [#allocation4 + $0x1], 0 }
   0x4   :  { %10 = vsyncpa [#allocation7], 0 }
   0x5   :  { %12 = vsyncpa [#allocation7 + $0x1], 0 }
   0x6   :  { %13 = vsyncpa [#allocation5], 0 }
   0x7   :  { %15 = vsyncpa [#allocation5 + $0x1], 0  ;;  %s1118_s9 = smov 0   ;;  %s1120_s10 = smov 0  }
   0x8   :  { %s1122_s11 = smov 0   ;;  %s1124_s12 = smov 0  }
   0x9   :  { %s1126_s13 = smov 0   ;;  %s1128_s14 = smov 0  }
   0xa   :  { %s1130_s15 = smov 0   ;;  %s1132_s16 = smov 0  }
   0xb   :  { %s1134_s17 = smov 0   ;;  %s1136_s18 = smov 0  }
   0xc   :  { %s1138_s19 = smov 0  }
   0xd LB: > { %1665 = sst [smem:[#allocation12_spill]] %s1087_s17  ;;  %s706_s20 = sadd.s32 4294967295, %s1095_s19   ;;  %s1095_s19 = sphi %s1138_s19, %s21_s19   ;;  %s1091_s18 = sphi %s1136_s18, %s1685_s18   ;;  %s1087_s17 = sphi %s1134_s17, %s1684_s17   ;;  %s1083_s16 = sphi %s1132_s16, %s1683_s16   ;;  %s1079_s15 = sphi %s1130_s15, %s1682_s15   ;;  %s1075_s14 = sphi %s1128_s14, %s1691_s14   ;;  %s1071_s13 = sphi %s1126_s13, %s1690_s13   ;;  %s1067_s12 = sphi %s1124_s12, %s1689_s12   ;;  %s1063_s11 = sphi %s1122_s11, %s1688_s11   ;;  %s1059_s10 = sphi %s1120_s10, %s1687_s10   ;;  %s1055_s9 = sphi %s1118_s9, %s1686_s9  }
   0xe   : > { %1666 = sst [smem:[#allocation13_spill]] %s1091_s18  ;;  %s707_s21 = sadd.s32 4294967294, %s1095_s19  }
   0xf   : > { %s30_s22 = sadd.s32 1, %s1087_s17  ;;  %s33_s23 = sadd.s32 1, %s1091_s18 }
  0x10   : > { %p31_p0 = scmp.ge.s32.totalorder %s30_s22, 2  ;;  %s708_s24 = sshll.u32 %s1091_s18, 1 }
  0x11   : > { %s1177_s25 = sadd.s32 %s1087_s17, %s708_s24  ;;  %s44_s26 = sadd.s32 1, %s1075_s14 }
  0x12   : > { %s1693_s22 = smov (%p31_p0, %s30_s22), 0  ;;  %s1695_s23 = smov (!%p31_p0, %s33_s23), %s1091_s18 }
  0x13   : > { %1667 = sst [smem:[#allocation14_spill]] %s1693_s22  ;;  %p51_p1 = scmp.ne.s32.totalorder %s1075_s14, %s1071_s13 }
  0x14   : > { %p52_p2 = scmp.eq.s32.totalorder %s1095_s19, 0  ;;  %p35_p3 = scmp.ge.s32.totalorder %s1695_s23, 2 }
  0x15   : > { %p57_p4 = scmp.ne.s32.totalorder %s1071_s13, %s1067_s12  ;;  %p58_p6 = scmp.eq.s32.totalorder %s706_s20, 0 }
  0x16   : > { %p1187_p5 = por %p52_p2, %p51_p1  ;;  %s1697_s23 = smov (%p35_p3, %s1695_s23), 0 }
  0x17   : > { %1669 = sst [smem:[#allocation15_spill]] %s1697_s23  ;;  %p1193_p7 = por %p58_p6, %p57_p4 }
  0x18   : > { %s100_s29 = sadd.s32 1, %s1063_s11  ;;  %s709_s30 = sshll.u32 %s1697_s23, 1 }
  0x19   : > { %s1670_s28 = scalar_select %p1193_p7, 1, 0 }
  0x1a   : > { %s97_s3 = ssub.s32 %s1091_s18, %s1697_s23  ;;  %s40_s4 = sadd.s32 %s709_s30, %s1693_s22 }
  0x1b   : > { %p98_p8 = scmp.eq.s32.totalorder %s97_s3, 0  ;;  %s41_s5 = ssub.s32 %s1177_s25, %s40_s4 }
  0x1c   : > { %p110_p9 = scmp.ne.s32.totalorder %s1063_s11, %s1059_s10  ;;  %p42_p10 = scmp.eq.s32.totalorder %s41_s5, 0 }
  0x1d   : > { %p111_p11 = scmp.eq.s32.totalorder %s706_s20, 3  ;;  %p116_p13 = scmp.ne.s32.totalorder %s1059_s10, %s1055_s9 }
  0x1e   : > { %s1206_s6 = scalar_select %p98_p8, %s1063_s11, %s100_s29  }
  0x1f   : > { %s1209_s7 = scalar_select %p42_p10, %s1075_s14, %s44_s26  }
  0x20   : > { %p1211_p12 = por %p111_p11, %p110_p9  ;;  %p117_p0 = scmp.eq.s32.totalorder %s707_s21, 3 }
  0x21   : > { %p752_p1 = scmp.lt.s32.totalorder %s1095_s19, 4  ;;  %s1221_s12 = sand.u32 1, %s1075_s14  }
  0x22   : > { %s1671_s8 = scalar_select %p1211_p12, 1, 0 }
  0x23   : > { %p1223_p2 = por %p117_p0, %p116_p13  ;;  %s1657_s20 = sshll.u32 %s1221_s12, 7 }
  0x24   : > { %s1658_s26 = sshll.u32 %s1177_s25, 11  ;;  %s1673_s0 = sld [smem:[#allocation16_spill]] }
  0x25   : > { %s1672_s24 = scalar_select %p1223_p2, 1, 0 }
  0x26   : > { %s141_s21 = scalar_lea.vmem [#allocation3], %s1657_s20  ;;  %p1240_p3 = pnand %p752_p1, %p1187_p5 }
  0x27   : > { %s150_s4 = sshll.u32 %s141_s21, 4  ;;  %s1244_s4 = int_to_ptr.vmem [resolvable:$true] %s150_s4 }
  0x28   : > { %p911_p6 = pneg %p1240_p3 }
  0x2a   : > { %s1234_s3 = scalar_lea.hbm %s1673_s0, %s1658_s26  ;;  %s914_s27 = scalar_lea.hbm %s1673_s0, 8192 }
  0x2b   : > { %s909_s29 = scalar_lea.hbm %s1234_s3, 2048  ;;  %p915_p5 = scmp.lt.u32.totalorder %s1234_s3, %s1673_s0 }
  0x2c   : > { %p910_p4 = scmp.ne.s32.totalorder %s1234_s3, %s909_s29  ;;  %p916_p10 = scmp.lt.u32.totalorder %s914_s27, %s909_s29 }
  0x2d   : > { %p918_p13 = scmp.lt.u32.totalorder %s909_s29, %s1234_s3 }
  0x2e   : > { %p912_p8 = pnand %p911_p6, %p910_p4  ;;  %p917_p11 = por %p916_p10, %p915_p5 }
  0x30   : > { %p913_p9 = pneg %p912_p8  ;;  %p919_p0 = por %p918_p13, %p917_p11 }
  0x32   : > { %p920_p1 = pnand %p919_p0, %p913_p9 }
  0x34   : > { %923 = shalt.err (!%p920_p1)
}
  0x35   : > { %s924_s23 = scalar_lea.vmem %s1244_s4, 2048  ;;  %s1097_s30 = smov [#allocation3]  }
  0x36   : > { %p925_p4 = scmp.ne.s32.totalorder %s1244_s4, %s924_s23  ;;  %s929_s21 = sshll.u32 %s1097_s30, 4  ;;  %s930_s21 = int_to_ptr.vmem [resolvable:$false] %s929_s21 }
  0x37   : > { %s931_s20 = scalar_lea.vmem %s930_s21, 4096  ;;  %p932_p12 = scmp.lt.s32.totalorder %s1244_s4, %s930_s21 }
  0x38   : > { %p927_p8 = pnand %p925_p4, %p911_p6  ;;  %p933_p5 = scmp.lt.s32.totalorder %s931_s20, %s924_s23 }
  0x3a   : > { %p928_p2 = pneg %p927_p8  ;;  %p934_p10 = por %p933_p5, %p932_p12 }
  0x3c   : > { %p935_p11 = pnand %p934_p10, %p928_p2 }
  0x3e   : > { %938 = shalt.err (!%p935_p11)
}
  0x3f   : > { %s1098_s26 = smov 128   ;;  %s1099_s29 = smov 8  }
  0x40   : > { %s1675_s23 = scalar_lea.sflag [#allocation4], %s1221_s12  ;;  %p722_p12 = scmp.ge.s32.totalorder %s1095_s19, 1 }
  0x41   : > { %744 = dma.hbm_to_vmem [thread:$0]  (!%p1240_p3), %s1234_s3, 2048, %s1244_s4, %s1675_s23, %s1098_s26, %s1098_s26, %s1099_s29  }
  0x42   : > { %p181_p2 = scmp.lt.s32.totalorder %s1095_s19, 5  ;;  %s1677_s30 = sshll.u32 %s1177_s25, 11 }
  0x43   : > { %s1288_s0 = scalar_lea.hbm %s1654_s1, %s1677_s30  ;;  %s1678_s22 = sshll.u32 %s1221_s12, 7 }
  0x44   : > { %p1279_p9 = pnand %p722_p12, %p181_p2  ;;  %s164_s18 = scalar_lea.vmem [#allocation6], %s1678_s22 }
  0x45   : > { %s173_s17 = sshll.u32 %s164_s18, 4  ;;  %s161_s3 = scalar_lea.sflag [#allocation7], %s1221_s12  ;;  %s1292_s17 = int_to_ptr.vmem [resolvable:$true] %s173_s17 }
  0x46   : > { %s939_s4 = scalar_lea.hbm %s1288_s0, 2048  ;;  %s944_s30 = scalar_lea.hbm %s1654_s1, 8192 }
  0x47   : > { %p940_p13 = scmp.ne.s32.totalorder %s1288_s0, %s939_s4  ;;  %p945_p4 = scmp.lt.u32.totalorder %s1288_s0, %s1654_s1 }
  0x48   : > { %p946_p8 = scmp.lt.u32.totalorder %s944_s30, %s939_s4  ;;  %p948_p10 = scmp.lt.u32.totalorder %s939_s4, %s1288_s0 }
  0x49   : > { %p942_p0 = pnand %p940_p13, %p911_p6 }
  0x4a   : > { %p947_p5 = por %p946_p8, %p945_p4 }
  0x4b   : > { %p943_p1 = pneg %p942_p0 }
  0x4c   : > { %p949_p11 = por %p948_p10, %p947_p5 }
  0x4e   : > { %p950_p12 = pnand %p949_p11, %p943_p1 }
  0x50   : > { %953 = shalt.err (!%p950_p12)
}
  0x51   : > { %s954_s18 = scalar_lea.vmem %s1292_s17, 2048  ;;  %s1100_s22 = smov [#allocation6]  }
  0x52   : > { %p955_p2 = scmp.ne.s32.totalorder %s1292_s17, %s954_s18  ;;  %s959_s25 = sshll.u32 %s1100_s22, 4  ;;  %s960_s25 = int_to_ptr.vmem [resolvable:$false] %s959_s25 }
  0x53   : > { %s961_s23 = scalar_lea.vmem %s960_s25, 4096  ;;  %p962_p7 = scmp.lt.s32.totalorder %s1292_s17, %s960_s25 }
  0x54   : > { %p957_p13 = pnand %p955_p2, %p911_p6  ;;  %p963_p4 = scmp.lt.s32.totalorder %s961_s23, %s954_s18 }
  0x56   : > { %p958_p0 = pneg %p957_p13  ;;  %p964_p8 = por %p963_p4, %p962_p7 }
  0x58   : > { %p965_p5 = pnand %p964_p8, %p958_p0 }
  0x5a   : > { %968 = shalt.err (!%p965_p5)
}
  0x5b   : > { %747 = dma.hbm_to_vmem [thread:$0]  (!%p1240_p3), %s1288_s0, 2048, %s1292_s17, %s161_s3, %s1098_s26, %s1098_s26, %s1099_s29  }
  0x5c   : > { %185 = sbr.rel (%p1279_p9) target bundleno = 389 (0x185), region = 28  ;;  %s187_s4 = sand.u32 (!%p1279_p9), 1, %s1071_s13  }
  0x5d   : > { %s723_s30 = sshll.u32 (!%p1279_p9), %s187_s4, 7  ;;  %s188_s21 = scalar_lea.sflag (!%p1279_p9), [#allocation4], %s187_s4 }
  0x5e   : > { %s1326_s20 = scalar_lea.vmem (!%p1279_p9), [#allocation3], %s723_s30  ;;  %p1679_p7 = scmp.ne.s32.totalorder (!%p1279_p9), %s1670_s28, 0 }
  0x63   : > { %1042 = dma.done.wait (%p1679_p7), %s188_s21, 2048  }
  0x64   : > { %1044 = vsyncadd (%p1679_p7), %s188_s21, 4294965248  ;;  %s197_s12 = scalar_lea.sflag [#allocation7], %s187_s4  ;;  %s1332_s5 = scalar_lea.vmem [#allocation6], %s723_s30 }
  0x65   : > { %1046 = dma.done.wait (%p1679_p7), %s197_s12, 2048  }
  0x66   : > { %1048 = vsyncadd (%p1679_p7), %s197_s12, 4294965248  ;;  %s223_s0 = sand.u32 1, %s1059_s10   ;;  %p726_p3 = scmp.ne.s32.totalorder %s1079_s15, 0 }
  0x67   : > { %s1341_s17 = sshll.u32 %s223_s0, 3  ;;  %vm236_vm0 = vcmask (!%p726_p3), 516096   ;;  %v1101_v0 = vmov (!%p726_p3), 0.0  }
  0x68   : > { %s225_s26 = scalar_lea.vmem [#allocation8], %s1341_s17  ;;  %235 = sbr.rel (%p726_p3) target bundleno = 111 (0x6f), region = 40  ;;  %237 = vst.msk [vmem:[#allocation2] sm:$0x1] (!%p726_p3), %vm236_vm0, %v1101_v0 }
  0x6f PF: > { %v1346_v1 = vld [vmem:[%s1332_s5] sm:$0xff]  ;;  %vm286_vm1 = vcmask 523264   ;;  %v1352_v3 = vld [vmem:[%s1332_s5 + $0x8] sm:$0xff]  ;;  %v1366_v9 = vld [vmem:[%s1332_s5 + $0x10] sm:$0xff]  ;;  %vm566_vm2 = vcmask 516096   ;;  %p727_p6 = scmp.ne.s32.totalorder %s1079_s15, 1 }
  0x70   : > { %v1349_v2 = vld [vmem:[%s1326_s20] sm:$0xff]  ;;  %v383_v4 = vmul.f32 %v1346_v1, %v1346_v1  ;;  %v384_v6 = vmul.f32 %v1352_v3, %v1352_v3  ;;  %v1361_v7 = vld [vmem:[%s1326_s20 + $0x8] sm:$0xff]  ;;  %v1369_v10 = vld [vmem:[%s1326_s20 + $0x10] sm:$0xff]  ;;  %v385_v15 = vmul.f32 %v1366_v9, %v1366_v9 }
  0x71   : > { %v270_v5 = vmul.f32 %v1349_v2, %v1349_v2  ;;  %v271_v8 = vmul.f32 %v1361_v7, %v1361_v7  ;;  %v272_v16 = vmul.f32 %v1369_v10, %v1369_v10  ;;  %v1380_v17 = vld [vmem:[%s1332_s5 + $0x18] sm:$0xff]  ;;  %v1392_v23 = vld [vmem:[%s1332_s5 + $0x20] sm:$0xff]  ;;  %v1404_v29 = vld [vmem:[%s1332_s5 + $0x28] sm:$0xff] }
  0x72   : > { %v399_v11 = vsel %vm286_vm1, %v383_v4, 0.0  ;;  %v402_v13 = vsel %vm286_vm1, %v384_v6, 0.0  ;;  %v1383_v18 = vld [vmem:[%s1326_s20 + $0x18] sm:$0xff]  ;;  %v405_v19 = vsel %vm286_vm1, %v385_v15, 0.0  ;;  %v386_v21 = vmul.f32 %v1380_v17, %v1380_v17  ;;  %v1395_v24 = vld [vmem:[%s1326_s20 + $0x20] sm:$0xff]  ;;  %v1407_v30 = vld [vmem:[%s1326_s20 + $0x28] sm:$0xff] }
  0x73   : > { %v287_v12 = vsel %vm286_vm1, %v270_v5, 0.0  ;;  %400 = vadd.xlane.f32.xlu1 %v399_v11  ;;  %v290_v14 = vsel %vm286_vm1, %v271_v8, 0.0  ;;  %v293_v20 = vsel %vm286_vm1, %v272_v16, 0.0  ;;  %v273_v22 = vmul.f32 %v1383_v18, %v1383_v18  ;;  %v1416_v35 = vld [vmem:[%s1332_s5 + $0x30] sm:$0xff]  ;;  %v1428_v41 = vld [vmem:[%s1332_s5 + $0x38] sm:$0xff]  ;;  %v1440_v47 = vld [vmem:[%s1332_s5 + $0x40] sm:$0xff] }
  0x74   : > { %288 = vadd.xlane.f32.xlu0 %v287_v12  ;;  %v408_v25 = vsel %vm286_vm1, %v386_v21, 0.0  ;;  %v387_v27 = vmul.f32 %v1392_v23, %v1392_v23  ;;  %v274_v28 = vmul.f32 %v1395_v24, %v1395_v24  ;;  %v388_v33 = vmul.f32 %v1404_v29, %v1404_v29  ;;  %v1419_v36 = vld [vmem:[%s1326_s20 + $0x30] sm:$0xff]  ;;  %v1431_v42 = vld [vmem:[%s1326_s20 + $0x38] sm:$0xff]  ;;  %v1443_v48 = vld [vmem:[%s1326_s20 + $0x40] sm:$0xff] }
  0x75   : > { %v296_v26 = vsel %vm286_vm1, %v273_v22, 0.0  ;;  %v275_v34 = vmul.f32 %v1407_v30, %v1407_v30  ;;  %v389_v39 = vmul.f32 %v1416_v35, %v1416_v35  ;;  %v276_v40 = vmul.f32 %v1419_v36, %v1419_v36  ;;  %v1452_v53 = vld [vmem:[%s1332_s5 + $0x48] sm:$0xff]  ;;  %v1464_v59 = vld [vmem:[%s1332_s5 + $0x50] sm:$0xff]  ;;  %v1476_v4 = vld [vmem:[%s1332_s5 + $0x58] sm:$0xff] }
  0x76   : > { %v411_v31 = vsel %vm286_vm1, %v387_v27, 0.0  ;;  %v299_v32 = vsel %vm286_vm1, %v274_v28, 0.0  ;;  %v414_v37 = vsel %vm286_vm1, %v388_v33, 0.0  ;;  %v390_v45 = vmul.f32 %v1428_v41, %v1428_v41  ;;  %v1455_v54 = vld [vmem:[%s1326_s20 + $0x48] sm:$0xff]  ;;  %v1467_v60 = vld [vmem:[%s1326_s20 + $0x50] sm:$0xff]  ;;  %v1479_v5 = vld [vmem:[%s1326_s20 + $0x58] sm:$0xff] }
  0x77   : > { %403 = vadd.xlane.f32.xlu1 %v402_v13  ;;  %v302_v38 = vsel %vm286_vm1, %v275_v34, 0.0  ;;  %v417_v43 = vsel %vm286_vm1, %v389_v39, 0.0  ;;  %v305_v44 = vsel %vm286_vm1, %v276_v40, 0.0  ;;  %v277_v46 = vmul.f32 %v1431_v42, %v1431_v42  ;;  %v1488_v13 = vld [vmem:[%s1332_s5 + $0x60] sm:$0xff]  ;;  %v1500_v21 = vld [vmem:[%s1332_s5 + $0x68] sm:$0xff]  ;;  %v1524_v39 = vld [vmem:[%s1332_s5 + $0x78] sm:$0xff] }
  0x78   : > { %291 = vadd.xlane.f32.xlu0 %v290_v14  ;;  %v420_v49 = vsel %vm286_vm1, %v390_v45, 0.0  ;;  %v391_v51 = vmul.f32 %v1440_v47, %v1440_v47  ;;  %v278_v52 = vmul.f32 %v1443_v48, %v1443_v48  ;;  %v392_v57 = vmul.f32 %v1452_v53, %v1452_v53  ;;  %v1491_v14 = vld [vmem:[%s1326_s20 + $0x60] sm:$0xff]  ;;  %v1503_v22 = vld [vmem:[%s1326_s20 + $0x68] sm:$0xff]  ;;  %v1527_v40 = vld [vmem:[%s1326_s20 + $0x78] sm:$0xff] }
  0x79   : > { %v308_v50 = vsel %vm286_vm1, %v277_v46, 0.0  ;;  %v279_v58 = vmul.f32 %v1455_v54, %v1455_v54  ;;  %v393_v63 = vmul.f32 %v1464_v59, %v1464_v59  ;;  %v280_v0 = vmul.f32 %v1467_v60, %v1467_v60 }
  0x7a   : > { %v423_v55 = vsel %vm286_vm1, %v391_v51, 0.0  ;;  %v311_v56 = vsel %vm286_vm1, %v278_v52, 0.0  ;;  %v426_v61 = vsel %vm286_vm1, %v392_v57, 0.0  ;;  %v394_v11 = vmul.f32 %v1476_v4, %v1476_v4 }
  0x7b   : > { %406 = vadd.xlane.f32.xlu1 %v405_v19  ;;  %v314_v62 = vsel %vm286_vm1, %v279_v58, 0.0  ;;  %v429_v6 = vsel %vm286_vm1, %v393_v63, 0.0  ;;  %v317_v8 = vsel %vm286_vm1, %v280_v0, 0.0  ;;  %v281_v12 = vmul.f32 %v1479_v5, %v1479_v5 }
  0x7c   : > { %294 = vadd.xlane.f32.xlu0 %v293_v20  ;;  %v432_v15 = vsel %vm286_vm1, %v394_v11, 0.0  ;;  %v395_v19 = vmul.f32 %v1488_v13, %v1488_v13  ;;  %v282_v20 = vmul.f32 %v1491_v14, %v1491_v14  ;;  %v396_v27 = vmul.f32 %v1500_v21, %v1500_v21 }
  0x7d   : > { %v320_v16 = vsel %vm286_vm1, %v281_v12, 0.0  ;;  %v283_v28 = vmul.f32 %v1503_v22, %v1503_v22  ;;  %v398_v45 = vmul.f32 %v1524_v39, %v1524_v39  ;;  %v285_v46 = vmul.f32 %v1527_v40, %v1527_v40 }
  0x7e   : > { %v438_v33 = vsel %vm286_vm1, %v396_v27, 0.0 }
  0x7f   : > { %409 = vadd.xlane.f32.xlu1 %v408_v25  ;;  %v435_v25 = vsel %vm286_vm1, %v395_v19, 0.0  ;;  %v326_v34 = vsel %vm286_vm1, %v283_v28, 0.0 }
  0x80   : > { %297 = vadd.xlane.f32.xlu0 %v296_v26  ;;  %v323_v26 = vsel %vm286_vm1, %v282_v20, 0.0 }
  0x83   : > { %412 = vadd.xlane.f32.xlu1 %v411_v31  ;;  %v1512_v31 = vld [vmem:[%s1332_s5 + $0x70] sm:$0xff] }
  0x84   : > { %300 = vadd.xlane.f32.xlu0 %v299_v32  ;;  %v1515_v32 = vld [vmem:[%s1326_s20 + $0x70] sm:$0xff] }
  0x87   : > { %415 = vadd.xlane.f32.xlu1 %v414_v37  ;;  %v397_v37 = vmul.f32 %v1512_v31, %v1512_v31 }
  0x88   : > { %303 = vadd.xlane.f32.xlu0 %v302_v38  ;;  %v284_v38 = vmul.f32 %v1515_v32, %v1515_v32 }
  0x8b   : > { %418 = vadd.xlane.f32.xlu1 %v417_v43  ;;  %v441_v43 = vsel %vm286_vm1, %v397_v37, 0.0 }
  0x8c   : > { %306 = vadd.xlane.f32.xlu0 %v305_v44  ;;  %v329_v44 = vsel %vm286_vm1, %v284_v38, 0.0 }
  0x8f   : > { %421 = vadd.xlane.f32.xlu1 %v420_v49  ;;  %v444_v49 = vsel %vm286_vm1, %v398_v45, 0.0 }
  0x90   : > { %309 = vadd.xlane.f32.xlu0 %v308_v50  ;;  %v332_v50 = vsel %vm286_vm1, %v285_v46, 0.0 }
  0x93   : > { %424 = vadd.xlane.f32.xlu1 %v423_v55 }
  0x94   : > { %312 = vadd.xlane.f32.xlu0 %v311_v56 }
  0x97   : > { %427 = vadd.xlane.f32.xlu1 %v426_v61 }
  0x98   : > { %315 = vadd.xlane.f32.xlu0 %v314_v62 }
  0x9b   : > { %430 = vadd.xlane.f32.xlu1 %v429_v6 }
  0x9c   : > { %318 = vadd.xlane.f32.xlu0 %v317_v8 }
  0x9f   : > { %433 = vadd.xlane.f32.xlu1 %v432_v15 }
  0xa0   : > { %321 = vadd.xlane.f32.xlu0 %v320_v16 }
  0xa3   : > { %436 = vadd.xlane.f32.xlu1 %v435_v25 }
  0xa4   : > { %324 = vadd.xlane.f32.xlu0 %v323_v26 }
  0xa7   : > { %439 = vadd.xlane.f32.xlu1 %v438_v33 }
  0xa8   : > { %327 = vadd.xlane.f32.xlu0 %v326_v34 }
  0xab   : > { %442 = vadd.xlane.f32.xlu1 %v441_v43 }
  0xac   : > { %330 = vadd.xlane.f32.xlu0 %v329_v44 }
  0xaf   : > { %445 = vadd.xlane.f32.xlu1 %v444_v49 }
  0xb0   : > { %333 = vadd.xlane.f32.xlu0 %v332_v50 }
 0x100   : > { %v401_v51 = vpop.xlane.xlu1 %400 }
 0x101   : > { %v289_v52 = vpop.xlane.xlu0 %288  ;;  %v447_v11 = vadd.f32 1e-12, %v401_v51 }
 0x102   : > { %v335_v12 = vadd.f32 1e-12, %v289_v52 }
 0x104   : > { %v404_v55 = vpop.xlane.xlu1 %403 }
 0x105   : > { %v292_v56 = vpop.xlane.xlu0 %291  ;;  %v448_v63 = vadd.f32 1e-12, %v404_v55 }
 0x106   : > { %v336_v0 = vadd.f32 1e-12, %v292_v56 }
 0x107   : > { %845 = vrsqrt.f32 %v448_v63 }
 0x108   : > { %v407_v57 = vpop.xlane.xlu1 %406  ;;  %847 = vrsqrt.f32 %v336_v0 }
 0x109   : > { %v295_v58 = vpop.xlane.xlu0 %294  ;;  %v449_v15 = vadd.f32 1e-12, %v407_v57  ;;  %849 = vrsqrt.f32 %v447_v11 }
 0x10a   : > { %v337_v20 = vadd.f32 1e-12, %v295_v58  ;;  %851 = vrsqrt.f32 %v335_v12 }
 0x10b   : > { %853 = vrsqrt.f32 %v449_v15 }
 0x10c   : > { %v410_v61 = vpop.xlane.xlu1 %409  ;;  %855 = vrsqrt.f32 %v337_v20 }
 0x10d   : > { %v298_v62 = vpop.xlane.xlu0 %297  ;;  %v450_v25 = vadd.f32 1e-12, %v410_v61 }
 0x10e   : > { %v338_v26 = vadd.f32 1e-12, %v298_v62 }
 0x10f   : > { %857 = vrsqrt.f32 %v450_v25 }
 0x110   : > { %v413_v6 = vpop.xlane.xlu1 %412  ;;  %859 = vrsqrt.f32 %v338_v26 }
 0x111   : > { %v301_v8 = vpop.xlane.xlu0 %300  ;;  %v451_v33 = vadd.f32 1e-12, %v413_v6  ;;  %v846_v44 = vpop.eup %845 }
 0x112   : > { %v339_v34 = vadd.f32 1e-12, %v301_v8  ;;  %v848_v46 = vpop.eup %847  ;;  %v480_v58 = vmul.f32 %v846_v44, %v1352_v3 }
 0x113   : > { %861 = vrsqrt.f32 %v451_v33  ;;  %v850_v51 = vpop.eup %849  ;;  %v368_v61 = vmul.f32 %v848_v46, %v1361_v7 }
 0x114   : > { %v416_v16 = vpop.xlane.xlu1 %415  ;;  %863 = vrsqrt.f32 %v339_v34  ;;  %v852_v57 = vpop.eup %851  ;;  %v479_v11 = vmul.f32 %v850_v51, %v1346_v1 }
 0x115   : > { %v304_v19 = vpop.xlane.xlu0 %303  ;;  %v452_v37 = vadd.f32 1e-12, %v416_v16  ;;  %v854_v63 = vpop.eup %853  ;;  %v496_v20 = vsub.f32 %v368_v61, %v480_v58 }
 0x116   : > { %v340_v45 = vadd.f32 1e-12, %v304_v19  ;;  %v856_v6 = vpop.eup %855  ;;  %v367_v19 = vmul.f32 %v852_v57, %v1349_v2  ;;  %v481_v25 = vmul.f32 %v854_v63, %v1366_v9 }
 0x117   : > { %865 = vrsqrt.f32 %v452_v37  ;;  %v369_v26 = vmul.f32 %v856_v6, %v1369_v10  ;;  %v513_v44 = vmul.f32 %v496_v20, %v496_v20 }
 0x118   : > { %v419_v27 = vpop.xlane.xlu1 %418  ;;  %867 = vrsqrt.f32 %v340_v45  ;;  %v495_v37 = vsub.f32 %v367_v19, %v479_v11 }
 0x119   : > { %v307_v28 = vpop.xlane.xlu0 %306  ;;  %v453_v49 = vadd.f32 1e-12, %v419_v27  ;;  %v858_v16 = vpop.eup %857  ;;  %v497_v45 = vsub.f32 %v369_v26, %v481_v25 }
 0x11a   : > { %v341_v50 = vadd.f32 1e-12, %v307_v28  ;;  %v860_v7 = vpop.eup %859  ;;  %v482_v46 = vmul.f32 %v858_v16, %v1380_v17  ;;  %v512_v57 = vmul.f32 %v495_v37, %v495_v37  ;;  %v529_v17 = vsel %vm286_vm1, %v513_v44, 0.0 }
 0x11b   : > { %869 = vrsqrt.f32 %v453_v49  ;;  %v370_v10 = vmul.f32 %v860_v7, %v1383_v18 }
 0x11c   : > { %v422_v38 = vpop.xlane.xlu1 %421  ;;  %871 = vrsqrt.f32 %v341_v50  ;;  %v528_v20 = vsel %vm286_vm1, %v512_v57, 0.0 }
 0x11d   : > { %v310_v43 = vpop.xlane.xlu0 %309  ;;  %v454_v52 = vadd.f32 1e-12, %v422_v38  ;;  %v862_v28 = vpop.eup %861  ;;  %v498_v6 = vsub.f32 %v370_v10, %v482_v46  ;;  %v530_v7 = vadd.f32 %v529_v17, %v528_v20 }
 0x11e   : > { %v342_v62 = vadd.f32 1e-12, %v310_v43  ;;  %v864_v33 = vpop.eup %863  ;;  %v483_v49 = vmul.f32 %v862_v28, %v1392_v23  ;;  %v514_v23 = vmul.f32 %v497_v45, %v497_v45 }
 0x11f   : > { %873 = vrsqrt.f32 %v454_v52  ;;  %v371_v50 = vmul.f32 %v864_v33, %v1395_v24 }
 0x120   : > { %v425_v55 = vpop.xlane.xlu1 %424  ;;  %875 = vrsqrt.f32 %v342_v62  ;;  %v531_v28 = vsel %vm286_vm1, %v514_v23, 0.0 }
 0x121   : > { %v313_v56 = vpop.xlane.xlu0 %312  ;;  %v455_v0 = vadd.f32 1e-12, %v425_v55  ;;  %v866_v2 = vpop.eup %865  ;;  %v499_v24 = vsub.f32 %v371_v50, %v483_v49 }
 0x122   : > { %v343_v8 = vadd.f32 1e-12, %v313_v56  ;;  %v868_v9 = vpop.eup %867  ;;  %v484_v63 = vmul.f32 %v866_v2, %v1404_v29 }
 0x123   : > { %877 = vrsqrt.f32 %v455_v0  ;;  %v372_v18 = vmul.f32 %v868_v9, %v1407_v30  ;;  %v516_v33 = vmul.f32 %v499_v24, %v499_v24 }
 0x124   : > { %v428_v12 = vpop.xlane.xlu1 %427  ;;  %879 = vrsqrt.f32 %v343_v8 }
 0x125   : > { %v316_v15 = vpop.xlane.xlu0 %315  ;;  %v456_v3 = vadd.f32 1e-12, %v428_v12  ;;  %v870_v51 = vpop.eup %869  ;;  %v500_v30 = vsub.f32 %v372_v18, %v484_v63 }
 0x126   : > { %v344_v27 = vadd.f32 1e-12, %v316_v15  ;;  %v872_v56 = vpop.eup %871  ;;  %v485_v11 = vmul.f32 %v870_v51, %v1416_v35  ;;  %v515_v35 = vmul.f32 %v498_v6, %v498_v6 }
 0x127   : > { %881 = vrsqrt.f32 %v456_v3  ;;  %v373_v12 = vmul.f32 %v872_v56, %v1419_v36  ;;  %v517_v46 = vmul.f32 %v500_v30, %v500_v30 }
 0x128   : > { %v431_v1 = vpop.xlane.xlu1 %430  ;;  %883 = vrsqrt.f32 %v344_v27  ;;  %v533_v10 = vsel %vm286_vm1, %v515_v35, 0.0 }
 0x129   : > { %v319_v34 = vpop.xlane.xlu0 %318  ;;  %v457_v38 = vadd.f32 1e-12, %v431_v1  ;;  %v874_v62 = vpop.eup %873  ;;  %v501_v1 = vsub.f32 %v373_v12, %v485_v11 }
 0x12a   : > { %v345_v43 = vadd.f32 1e-12, %v319_v34  ;;  %v876_v0 = vpop.eup %875  ;;  %v486_v25 = vmul.f32 %v874_v62, %v1428_v41 }
 0x12b   : > { %885 = vrsqrt.f32 %v457_v38  ;;  %v374_v26 = vmul.f32 %v876_v0, %v1431_v42  ;;  %v532_v42 = vadd.f32 %v531_v28, %v530_v7 }
 0x12c   : > { %887 = vrsqrt.f32 %v345_v43  ;;  %v434_v52 = vpop.xlane.xlu1 %433 }
 0x12d   : > { %v322_v55 = vpop.xlane.xlu0 %321  ;;  %v458_v58 = vadd.f32 1e-12, %v434_v52  ;;  %v878_v8 = vpop.eup %877  ;;  %v502_v9 = vsub.f32 %v374_v26, %v486_v25  ;;  %v534_v63 = vadd.f32 %v533_v10, %v532_v42 }
 0x12e   : > { %v346_v61 = vadd.f32 1e-12, %v322_v55  ;;  %v880_v19 = vpop.eup %879  ;;  %v487_v34 = vmul.f32 %v878_v8, %v1440_v47  ;;  %v535_v47 = vsel %vm286_vm1, %v516_v33, 0.0 }
 0x12f   : > { %889 = vrsqrt.f32 %v458_v58  ;;  %v375_v37 = vmul.f32 %v880_v19, %v1443_v48  ;;  %v518_v48 = vmul.f32 %v501_v1, %v501_v1  ;;  %v536_v6 = vadd.f32 %v535_v47, %v534_v63 }
 0x130   : > { %891 = vrsqrt.f32 %v346_v61  ;;  %v437_v15 = vpop.xlane.xlu1 %436 }
 0x131   : > { %v325_v16 = vpop.xlane.xlu0 %324  ;;  %v459_v3 = vadd.f32 1e-12, %v437_v15  ;;  %v882_v27 = vpop.eup %881  ;;  %v503_v51 = vsub.f32 %v375_v37, %v487_v34  ;;  %v539_v24 = vsel %vm286_vm1, %v518_v48, 0.0 }
 0x132   : > { %v347_v29 = vadd.f32 1e-12, %v325_v16  ;;  %v884_v36 = vpop.eup %883  ;;  %v488_v49 = vmul.f32 %v882_v27, %v1452_v53  ;;  %v537_v53 = vsel %vm286_vm1, %v517_v46, 0.0 }
 0x133   : > { %893 = vrsqrt.f32 %v459_v3  ;;  %v376_v50 = vmul.f32 %v884_v36, %v1455_v54  ;;  %v519_v54 = vmul.f32 %v502_v9, %v502_v9  ;;  %v520_v11 = vmul.f32 %v503_v51, %v503_v51 }
 0x134   : > { %895 = vrsqrt.f32 %v347_v29  ;;  %v440_v38 = vpop.xlane.xlu1 %439  ;;  %v538_v20 = vadd.f32 %v537_v53, %v536_v6 }
 0x135   : > { %v328_v43 = vpop.xlane.xlu0 %327  ;;  %v886_v2 = vpop.eup %885  ;;  %v460_v44 = vadd.f32 1e-12, %v440_v38  ;;  %v504_v18 = vsub.f32 %v376_v50, %v488_v49  ;;  %v541_v3 = vsel %vm286_vm1, %v519_v54, 0.0  ;;  %v543_v26 = vsel %vm286_vm1, %v520_v11, 0.0 }
 0x136   : > { %v348_v41 = vadd.f32 1e-12, %v328_v43  ;;  %v888_v45 = vpop.eup %887  ;;  %v489_v57 = vmul.f32 %v886_v2, %v1464_v59  ;;  %v540_v30 = vadd.f32 %v539_v24, %v538_v20 }
 0x137   : > { %897 = vrsqrt.f32 %v460_v44  ;;  %v377_v58 = vmul.f32 %v888_v45, %v1467_v60  ;;  %v521_v29 = vmul.f32 %v504_v18, %v504_v18 }
 0x138   : > { %899 = vrsqrt.f32 %v348_v41  ;;  %v443_v52 = vpop.xlane.xlu1 %442  ;;  %v542_v33 = vadd.f32 %v541_v3, %v540_v30 }
 0x139   : > { %v331_v55 = vpop.xlane.xlu0 %330  ;;  %v890_v56 = vpop.eup %889  ;;  %v461_v61 = vadd.f32 1e-12, %v443_v52  ;;  %v505_v12 = vsub.f32 %v377_v58, %v489_v57  ;;  %v545_v1 = vsel %vm286_vm1, %v521_v29, 0.0 }
 0x13a   : > { %v349_v62 = vadd.f32 1e-12, %v331_v55  ;;  %v892_v17 = vpop.eup %891  ;;  %v490_v0 = vmul.f32 %v890_v56, %v1476_v4  ;;  %v544_v37 = vadd.f32 %v543_v26, %v542_v33 }
 0x13b   : > { %v378_v23 = vmul.f32 %v892_v17, %v1479_v5  ;;  %901 = vrsqrt.f32 %v461_v61  ;;  %v522_v27 = vmul.f32 %v505_v12, %v505_v12 }
 0x13c   : > { %903 = vrsqrt.f32 %v349_v62  ;;  %v446_v59 = vpop.xlane.xlu1 %445  ;;  %v546_v41 = vadd.f32 %v545_v1, %v544_v37 }
 0x13d   : > { %v334_v8 = vpop.xlane.xlu0 %333  ;;  %v894_v60 = vpop.eup %893  ;;  %v462_v15 = vadd.f32 1e-12, %v446_v59  ;;  %v506_v5 = vsub.f32 %v378_v23, %v490_v0  ;;  %v511_v0 = vld [vmem:[#allocation2] sm:$0x1] }
 0x13e   : > { %v350_v16 = vadd.f32 1e-12, %v334_v8  ;;  %v896_v19 = vpop.eup %895  ;;  %v491_v4 = vmul.f32 %v894_v60, %v1488_v13 }
 0x13f   : > { %v379_v7 = vmul.f32 %v896_v19, %v1491_v14  ;;  %905 = vrsqrt.f32 %v462_v15  ;;  %v523_v34 = vmul.f32 %v506_v5, %v506_v5  ;;  %v547_v14 = vsel %vm286_vm1, %v522_v27, 0.0 }
 0x140   : > { %907 = vrsqrt.f32 %v350_v16  ;;  %v548_v9 = vadd.f32 %v547_v14, %v546_v41 }
 0x141   : > { %v898_v25 = vpop.eup %897  ;;  %v507_v28 = vsub.f32 %v379_v7, %v491_v4  ;;  %v549_v42 = vsel %vm286_vm1, %v523_v34, 0.0 }
 0x142   : > { %v900_v35 = vpop.eup %899  ;;  %v492_v36 = vmul.f32 %v898_v25, %v1500_v21  ;;  %v550_v47 = vadd.f32 %v549_v42, %v548_v9 }
 0x143   : > { %v380_v13 = vmul.f32 %v900_v35, %v1503_v22  ;;  %v524_v43 = vmul.f32 %v507_v28, %v507_v28 }
 0x145   : > { %v902_v38 = vpop.eup %901  ;;  %v508_v2 = vsub.f32 %v380_v13, %v492_v36  ;;  %v551_v49 = vsel %vm286_vm1, %v524_v43, 0.0 }
 0x146   : > { %v904_v44 = vpop.eup %903  ;;  %v493_v45 = vmul.f32 %v902_v38, %v1512_v31  ;;  %v552_v31 = vadd.f32 %v551_v49, %v550_v47 }
 0x147   : > { %v525_v46 = vmul.f32 %v508_v2, %v508_v2  ;;  %v381_v21 = vmul.f32 %v904_v44, %v1515_v32 }
 0x149   : > { %v906_v10 = vpop.eup %905  ;;  %v509_v22 = vsub.f32 %v381_v21, %v493_v45  ;;  %v553_v51 = vsel %vm286_vm1, %v525_v46, 0.0 }
 0x14a   : > { %v908_v50 = vpop.eup %907  ;;  %v494_v48 = vmul.f32 %v906_v10, %v1524_v39  ;;  %v554_v58 = vadd.f32 %v553_v51, %v552_v31 }
 0x14b   : > { %v526_v52 = vmul.f32 %v509_v22, %v509_v22  ;;  %v382_v55 = vmul.f32 %v908_v50, %v1527_v40  ;;  %v572_v40 = vlaneseq (!%p727_p6) }
 0x14d   : > { %v555_v56 = vsel %vm286_vm1, %v526_v52, 0.0  ;;  %v510_v57 = vsub.f32 %v382_v55, %v494_v48  ;;  %v573_v24 = vshrl.u32 (!%p727_p6), %v572_v40, 7 }
 0x14e   : > { %v556_v61 = vadd.f32 %v555_v56, %v554_v58 }
 0x14f   : > { %v527_v32 = vmul.f32 %v510_v57, %v510_v57  ;;  %vm574_vm3 = vcmp.eq.s32.totalorder (!%p727_p6), %v573_v24, 0 }
 0x151   : > { %v557_v62 = vsel %vm286_vm1, %v527_v32, 0.0 }
 0x152   : > { %v558_v17 = vadd.f32 %v557_v62, %v556_v61 }
 0x154   : > { %v559_v63 = vrot.slane %v558_v17, 4 }
 0x156   : > { %v560_v53 = vadd.f32 %v559_v63, %v558_v17 }
 0x158   : > { %v561_v54 = vrot.slane %v560_v53, 2 }
 0x15a   : > { %v562_v18 = vadd.f32 %v561_v54, %v560_v53 }
 0x15c   : > { %v563_v39 = vrot.slane %v562_v18, 1  ;;  %571 = sbr.rel (%p727_p6) target bundleno = 364 (0x16c), region = 44 }
 0x15e   : > { %v564_v23 = vadd.f32 %v563_v39, %v562_v18 }
 0x160   : > { %v565_v6 = vadd.f32 %v564_v23, %v511_v0 }
 0x162   : > { %567 = vst.msk [vmem:[#allocation2] sm:$0x1] %vm566_vm2, %v565_v6 }
 0x169   : > { %v728_v59 = vld [vmem:[#allocation2] ss:$0 sm:$0xff] }
 0x16a   : > { %v582_v8 = vsel %vm574_vm3, %v728_v59, 0.0 }
 0x16b   : > { %583 = vst.msk [vmem:[%s225_s26] sm:$0xff] %vm286_vm1, %v582_v8 }
 0x16c PF: > { %s730_s28 = sshll.u32 %s1083_s16, 7  ;;  %s598_s3 = sshll.u32 %s225_s26, 4  ;;  %s599_s3 = int_to_ptr.vmem [resolvable:$true] %s598_s3 }
 0x16d   : > { %s1593_s15 = scalar_lea.hbm %s1655_s2, %s730_s28  ;;  %s585_s18 = scalar_lea.sflag [#allocation5], %s223_s0 }
 0x16e   : > { %s969_s22 = scalar_lea.vmem %s599_s3, 128  ;;  %p1680_p1 = scmp.ne.s32.totalorder %s1671_s8, 0 }
 0x16f   : > { %p970_p9 = scmp.ne.s32.totalorder %s599_s3, %s969_s22  ;;  %s1102_s25 = smov [#allocation8]  }
 0x170   : > { %s973_s23 = sshll.u32 %s1102_s25, 4  ;;  %s974_s23 = int_to_ptr.vmem [resolvable:$false] %s973_s23 }
 0x171   : > { %p971_p10 = pnand %p970_p9, %p1680_p1  ;;  %s975_s4 = scalar_lea.vmem %s974_s23, 256 }
 0x172   : > { %p976_p12 = scmp.lt.s32.totalorder %s599_s3, %s974_s23  ;;  %p977_p2 = scmp.lt.s32.totalorder %s975_s4, %s969_s22 }
 0x173   : > { %p972_p11 = pneg %p971_p10 }
 0x174   : > { %p978_p13 = por %p977_p2, %p976_p12 }
 0x176   : > { %p979_p0 = pnand %p978_p13, %p972_p11 }
 0x178   : > { %982 = shalt.err (!%p979_p0)
}
 0x179   : > { %s983_s16 = scalar_lea.hbm %s1593_s15, 128  ;;  %s987_s20 = scalar_lea.hbm %s1655_s2, 256 }
 0x17a   : > { %p984_p4 = scmp.ne.s32.totalorder %s1593_s15, %s983_s16  ;;  %p988_p7 = scmp.lt.u32.totalorder %s1593_s15, %s1655_s2 }
 0x17b   : > { %p989_p3 = scmp.lt.u32.totalorder %s987_s20, %s983_s16  ;;  %p991_p9 = scmp.lt.u32.totalorder %s983_s16, %s1593_s15 }
 0x17c   : > { %p985_p8 = pnand %p984_p4, %p1680_p1 }
 0x17d   : > { %p990_p6 = por %p989_p3, %p988_p7 }
 0x17e   : > { %p986_p5 = pneg %p985_p8 }
 0x17f   : > { %p992_p10 = por %p991_p9, %p990_p6 }
 0x181   : > { %p993_p11 = pnand %p992_p10, %p986_p5 }
 0x183   : > { %996 = shalt.err (!%p993_p11)
}
 0x184   : > { %739 = dma.vmem_to_hbm [thread:$0]  (%p1680_p1), %s599_s3, 128, %s1593_s15, %s585_s18  }
 0x185 PF: > { %p753_p12 = scmp.ge.s32.totalorder %s1095_s19, 2  ;;  %s610_s0 = sand.u32 1, %s1055_s9  }
 0x186   : > { %p1681_p2 = scmp.ne.s32.totalorder %s1672_s24, 0  ;;  %s611_s17 = scalar_lea.sflag [#allocation5], %s610_s0 }
 0x188   : > { %p749_p13 = pnand %p753_p12, %p1681_p2 }
 0x18a   : > { %1050 = dma.done.wait (!%p749_p13), %s611_s17, 128  }
 0x18b   : > { %1052 = vsyncadd (!%p749_p13), %s611_s17, 4294967168  ;;  %s21_s19 = sadd.s32 1, %s1095_s19   ;;  %s1682_s15 = sld [smem:[#allocation12_spill]] }
 0x18c   : > { %p18_p0 = scmp.ge.s32.totalorder %s21_s19, 6   ;;  %s1683_s16 = sld [smem:[#allocation13_spill]] }
 0x18d   : > { %s1684_s17 = sld [smem:[#allocation14_spill]]  ;;  %s1685_s18 = sld [smem:[#allocation15_spill]] }
 0x18e   : > { %s1686_s9 = smov %s1059_s10  ;;  %s1687_s10 = smov %s1063_s11 }
 0x18f   : > { %s1688_s11 = smov %s1206_s6  ;;  %s1689_s12 = smov %s1071_s13 }
 0x190   : > { %s1690_s13 = smov %s1075_s14  ;;  %s1691_s14 = smov %s1209_s7 }
 0x191   :  { %20 = sbr.rel (!%p18_p0) target bundleno = 13 (0xd), region = 94 }
 0x198   :  { %616 = vsyncpa [#allocation4], 1 }
 0x199   :  { %618 = vsyncpa [#allocation4 + $0x1], 1 }
 0x19a   :  { %619 = vsyncpa [#allocation7], 1 }
 0x19b   :  { %621 = vsyncpa [#allocation7 + $0x1], 1 }
 0x19c   :  { %622 = vsyncpa [#allocation5], 1 }
 0x19d   :  { %624 = vsyncpa [#allocation5 + $0x1], 1 }

</bundles_post_ra>
